<compile_context>
chip_gen: v7x
topology: tpu7x:2x2x1
jax: 0.10.0
libtpu: 0.0.40
codegen_flags: <defaults>
</compile_context>

<pallas_src>
import functools

import jax
import jax.numpy as jnp
from jax.experimental import pallas as pl
from jax.experimental.pallas import tpu as pltpu

LN_EPS = 1e-5   # torch nn.LayerNorm default
LANE = 128
SUBLANE = 8


def _round_up(x: int, m: int) -> int:
    return ((x + m - 1) // m) * m


def _cdiv(a: int, b: int) -> int:
    return -(-a // b)


def node_encoder_kernel(x_ref, w_ref, b_ref, g_ref, beta_ref, o_ref, *, n_valid):
    # x_ref:    (block_rows, in_features)    input row tile (native dtype)
    # w_ref:    (in_features, out_padded)    weight (native dtype, lane-padded)
    # b_ref:    (1, out_padded)              linear bias (zero in padded lanes)
    # g_ref:    (1, out_padded)              LN gamma    (zero in padded lanes)
    # beta_ref: (1, out_padded)              LN beta     (zero in padded lanes)
    # o_ref:    (block_rows, out_padded)
    # n_valid:  static int, number of real (unpadded) output features
    x = x_ref[...]
    w = w_ref[...]

    # Linear: native-dtype operands on the MXU, f32 accumulation.
    y = jnp.dot(x, w, preferred_element_type=jnp.float32)
    y = y + b_ref[...].astype(jnp.float32)

    n_padded = y.shape[-1]
    pad = n_padded - n_valid
    inv_n = 1.0 / float(n_valid)

    # Padded W/bias columns are zero, so padded lanes of y are exactly 0:
    #   * sum(y) has no padded-lane contribution,
    #   * (y - mean) in a padded lane is exactly -mean, so the unmasked
    #     sum((y-mean)^2) over-counts by pad * mean^2.
    # Scalar correction avoids the per-step iota/cmp/select full-tile passes.
    mean = jnp.sum(y, axis=-1, keepdims=True) * inv_n
    centered = y - mean
    sq_sum = jnp.sum(centered * centered, axis=-1, keepdims=True)
    if pad:
        sq_sum = sq_sum - float(pad) * mean * mean
    var = sq_sum * inv_n
    y_norm = centered * jax.lax.rsqrt(var + LN_EPS)

    # LN affine (gamma/beta zero in padded lanes -> padded output lanes are 0).
    y_out = y_norm * g_ref[...].astype(jnp.float32) + beta_ref[...].astype(jnp.float32)

    # ReLU
    o_ref[...] = jnp.maximum(y_out, 0.0).astype(o_ref.dtype)


@functools.lru_cache(maxsize=1)
def _vmem_budgets():
    """(vmem_limit_bytes, streaming_tile_budget_bytes), generation-aware."""
    try:
        info = pltpu.get_tpu_info()
        cap = int(getattr(info, "vmem_capacity_bytes", 0) or 0)
    except Exception:
        cap = 0
    if cap >= 100 * 1024 * 1024:
        # v5e / v6e: 128 MiB physical VMEM -> big tiles, fewer grid steps.
        return 96 * 1024 * 1024, 64 * 1024 * 1024
    # v7x (64 MiB physical, 32 MiB scoped default) or unknown: conservative.
    return 32 * 1024 * 1024, 16 * 1024 * 1024


def _choose_block_rows(rows, requested, in_lane_padded, out_padded,
                       x_itemsize, out_itemsize, stream_budget, sublane):
    """Row-tile size: big, VMEM-safe (physical footprint), >=4 even grid steps."""
    rows_s = _round_up(rows, sublane)

    # Physical (lane-padded to 128), double-buffered streaming footprint / row.
    per_row = 2 * (in_lane_padded * x_itemsize + out_padded * out_itemsize)
    vmem_cap = max(sublane, (stream_budget // per_row) // sublane * sublane)

    br = max(sublane, min(_round_up(requested, sublane), vmem_cap, rows_s))

    # Pipeline steady state (1-TC chips) and balanced 2-TC sharding (v7x):
    # aim for an even grid of >= 4 steps whenever there are enough rows.
    max_steps = max(1, rows_s // sublane)
    steps = _cdiv(rows_s, br)
    if max_steps >= 2:
        steps = max(steps, min(4, max_steps))
        if steps % 2 == 1 and steps + 1 <= max_steps:
            steps += 1
    br = max(sublane, min(br, _round_up(_cdiv(rows_s, steps), sublane)))
    return br


@functools.partial(jax.jit, static_argnames=("block_rows", "pad_output"))
def node_encoder(inputs, weight, bias, ln_gamma, ln_beta, *,
                 block_rows=512, pad_output=False):
    """inputs: (..., in_features) -> (..., out_features). weight: (in, out)."""
    in_features, out_features = weight.shape
    orig_shape = inputs.shape

    x2d = inputs.reshape(-1, in_features)
    rows = x2d.shape[0]

    # ---- lane-dense output: pad the feature axis to a multiple of 128 -------
    out_padded = _round_up(out_features, LANE)
    pad_f = out_padded - out_features
    if pad_f:
        weight_p = jnp.pad(weight, ((0, 0), (0, pad_f)))
        bias_p = jnp.pad(bias, (0, pad_f))
        gamma_p = jnp.pad(ln_gamma, (0, pad_f))
        beta_p = jnp.pad(ln_beta, (0, pad_f))
    else:
        weight_p, bias_p, gamma_p, beta_p = weight, bias, ln_gamma, ln_beta

    b2d = bias_p.reshape(1, out_padded)
    g2d = gamma_p.reshape(1, out_padded)
    beta2d = beta_p.reshape(1, out_padded)

    x_itemsize = jnp.dtype(inputs.dtype).itemsize
    out_itemsize = x_itemsize
    w_itemsize = jnp.dtype(weight.dtype).itemsize

    vmem_limit, tile_budget = _vmem_budgets()

    # Physical VMEM footprint of the resident (single-buffered) param blocks.
    w_sublane = max(SUBLANE, 32 // w_itemsize)
    resident_bytes = (_round_up(in_features, w_sublane) * out_padded * w_itemsize
                      + 3 * SUBLANE * out_padded * w_itemsize)
    # TODO(synk): if resident_bytes > ~vmem_limit // 3, add a K grid axis
    #             ("arbitrary") with an f32 VMEM accumulator instead of keeping
    #             the whole weight resident (threshold ~2x lower on v7x).
    stream_budget = max(256 * 1024, tile_budget - resident_bytes)

    # dtype-packed sublane multiple: 8 (f32) / 16 (bf16) / 32 (int8).
    sublane = max(SUBLANE, 32 // x_itemsize)
    in_lane_padded = _round_up(in_features, LANE)

    # ---- row tiling: no padding/copy of x; partial last tile is masked ------
    br = _choose_block_rows(rows, block_rows, in_lane_padded, out_padded,
                            x_itemsize, out_itemsize, stream_budget, sublane)
    grid = (_cdiv(rows, br),)

    kernel = functools.partial(node_encoder_kernel, n_valid=out_features)

    cost = pl.CostEstimate(
        flops=2 * rows * in_features * out_padded,
        transcendentals=rows,          # one rsqrt per row
        bytes_accessed=(rows * in_features * x_itemsize
                        + in_features * out_padded * w_itemsize
                        + 3 * out_padded * w_itemsize
                        + rows * out_padded * out_itemsize),
    )

    # Grid-invariant operands: single-buffer them (index_map is constant, so
    # double-buffering would only waste VMEM that the row tile can use).
    param_mode = pl.Buffered(1)

    out2d = pl.pallas_call(
        kernel,
        out_shape=jax.ShapeDtypeStruct((rows, out_padded), inputs.dtype),
        grid_spec=pltpu.PrefetchScalarGridSpec(
            num_scalar_prefetch=0,
            grid=grid,
            in_specs=[
                pl.BlockSpec((br, in_features), lambda i: (i, 0)),
                pl.BlockSpec((in_features, out_padded), lambda i: (0, 0),
                             pipeline_mode=param_mode),
                pl.BlockSpec((1, out_padded), lambda i: (0, 0),
                             pipeline_mode=param_mode),
                pl.BlockSpec((1, out_padded), lambda i: (0, 0),
                             pipeline_mode=param_mode),
                pl.BlockSpec((1, out_padded), lambda i: (0, 0),
                             pipeline_mode=param_mode),
            ],
            out_specs=pl.BlockSpec((br, out_padded), lambda i: (i, 0)),
        ),
        compiler_params=pltpu.CompilerParams(
            dimension_semantics=("parallel",),
            vmem_limit_bytes=vmem_limit,
        ),
        cost_estimate=cost,
    )(x2d, weight_p, b2d, g2d, beta2d)

    if pad_output:
        # Lane-padded result (padded lanes are exactly 0): zero extra HBM traffic.
        return out2d.reshape(*orig_shape[:-1], out_padded)

    # NOTE: this lane un-padding slice fuses into downstream consumers inside a
    # larger jit; pass pad_output=True to avoid even the possibility of a copy.
    out2d = out2d[:, :out_features]
    return out2d.reshape(*orig_shape[:-1], out_features)


def node_encoder_ref(inputs, weight, bias, ln_gamma, ln_beta):
    y = jnp.dot(inputs.astype(jnp.float32), weight.astype(jnp.float32)) + bias
    mean = jnp.mean(y, axis=-1, keepdims=True)
    var = jnp.mean((y - mean) ** 2, axis=-1, keepdims=True)
    y = (y - mean) / jnp.sqrt(var + LN_EPS)
    y = y * ln_gamma + ln_beta
    return jnp.maximum(y, 0.0).astype(inputs.dtype)


if __name__ == "__main__":
    # Small shapes consistent with the module: (batch, seq, in_features)
    batch, seq, in_features, out_features = 2, 8, 16, 32

    key = jax.random.PRNGKey(0)
    k_x, k_w, k_b, k_g, k_beta = jax.random.split(key, 5)

    inputs = jax.random.normal(k_x, (batch, seq, in_features), dtype=jnp.float32)

    # Deterministic synthetic parameters (shapes from nn.Linear / nn.LayerNorm).
    # weight stored as (in_features, out_features) so the kernel does x @ W.
    lim = 1.0 / (in_features ** 0.5)
    weight = jax.random.uniform(
        k_w, (in_features, out_features), minval=-lim, maxval=lim, dtype=jnp.float32
    )
    bias = jax.random.uniform(
        k_b, (out_features,), minval=-lim, maxval=lim, dtype=jnp.float32
    )
    ln_gamma = jnp.ones((out_features,), dtype=jnp.float32)
    ln_beta = jnp.zeros((out_features,), dtype=jnp.float32)

    out = node_encoder(inputs, weight, bias, ln_gamma, ln_beta)
    out = jax.block_until_ready(out)

    ref = node_encoder_ref(inputs, weight, bias, ln_gamma, ln_beta)
    assert out.shape == (batch, seq, out_features)
    assert jnp.allclose(out, ref, atol=1e-5, rtol=1e-5), "mismatch vs reference"

    print("KERNEL_OK")
</pallas_src>

<mosaic_0001>
module attributes {stable_mosaic.version = 11 : i64} {
  func.func @node_encoder_kernel(%arg0: i32, %arg1: memref<8x16xf32, #tpu.memory_space<vmem>>, %arg2: memref<16x128xf32, #tpu.memory_space<vmem>>, %arg3: memref<1x128xf32, #tpu.memory_space<vmem>>, %arg4: memref<1x128xf32, #tpu.memory_space<vmem>>, %arg5: memref<1x128xf32, #tpu.memory_space<vmem>>, %arg6: memref<8x128xf32, #tpu.memory_space<vmem>>) attributes {dimension_semantics = [#tpu.dimension_semantics<parallel>], iteration_bounds = array<i64: 2>, scalar_prefetch = 0 : i64, scratch_operands = 0 : i64, tpu.core_type = #tpu.core_type<tc>, window_params = [{transform_indices = @transform_0, window_bounds = array<i64: 8, 16>}, {pipeline_mode = #tpu.pipeline_mode<synchronous>, transform_indices = @transform_1, window_bounds = array<i64: 16, 128>}, {pipeline_mode = #tpu.pipeline_mode<synchronous>, transform_indices = @transform_2, window_bounds = array<i64: 1, 128>}, {pipeline_mode = #tpu.pipeline_mode<synchronous>, transform_indices = @transform_3, window_bounds = array<i64: 1, 128>}, {pipeline_mode = #tpu.pipeline_mode<synchronous>, transform_indices = @transform_4, window_bounds = array<i64: 1, 128>}, {transform_indices = @transform_5, window_bounds = array<i64: 8, 128>}]} {
    %c0 = arith.constant 0 : index
    %c0_0 = arith.constant 0 : index
    %0 = vector.load %arg1[%c0, %c0_0] : memref<8x16xf32, #tpu.memory_space<vmem>>, vector<8x16xf32>
    %c0_1 = arith.constant 0 : index
    %c0_2 = arith.constant 0 : index
    %1 = vector.load %arg2[%c0_1, %c0_2] : memref<16x128xf32, #tpu.memory_space<vmem>>, vector<16x128xf32>
    %cst = arith.constant dense<0.000000e+00> : vector<8x128xf32>
    %2 = tpu.matmul %0, %1, %cst {dimension_numbers = #tpu.dot_dimension_numbers<[1], [0], [0], [1], [0, 0, 1, 1], [], []>} : vector<8x16xf32>, vector<16x128xf32>, vector<8x128xf32> -> vector<8x128xf32>
    %c0_3 = arith.constant 0 : index
    %c0_4 = arith.constant 0 : index
    %3 = vector.load %arg3[%c0_3, %c0_4] : memref<1x128xf32, #tpu.memory_space<vmem>>, vector<1x128xf32>
    %4 = vector.broadcast %3 : vector<1x128xf32> to vector<8x128xf32>
    %5 = arith.addf %2, %4 : vector<8x128xf32>
    %cst_5 = arith.constant dense<0.000000e+00> : vector<8xf32>
    %6 = vector.multi_reduction <add>, %5, %cst_5 [1] : vector<8x128xf32> to vector<8xf32>
    %7 = vector.shape_cast %6 : vector<8xf32> to vector<8x1xf32>
    %cst_6 = arith.constant 3.125000e-02 : f32
    %8 = vector.broadcast %cst_6 : f32 to vector<8x1xf32>
    %9 = arith.mulf %7, %8 : vector<8x1xf32>
    %10 = vector.broadcast %9 : vector<8x1xf32> to vector<8x128xf32>
    %11 = arith.subf %5, %10 : vector<8x128xf32>
    %12 = arith.mulf %11, %11 : vector<8x128xf32>
    %cst_7 = arith.constant dense<0.000000e+00> : vector<8xf32>
    %13 = vector.multi_reduction <add>, %12, %cst_7 [1] : vector<8x128xf32> to vector<8xf32>
    %14 = vector.shape_cast %13 : vector<8xf32> to vector<8x1xf32>
    %cst_8 = arith.constant 9.600000e+01 : f32
    %15 = vector.broadcast %cst_8 : f32 to vector<8x1xf32>
    %16 = arith.mulf %15, %9 : vector<8x1xf32>
    %17 = arith.mulf %16, %9 : vector<8x1xf32>
    %18 = arith.subf %14, %17 : vector<8x1xf32>
    %cst_9 = arith.constant 3.125000e-02 : f32
    %19 = vector.broadcast %cst_9 : f32 to vector<8x1xf32>
    %20 = arith.mulf %18, %19 : vector<8x1xf32>
    %cst_10 = arith.constant 9.99999974E-6 : f32
    %21 = vector.broadcast %cst_10 : f32 to vector<8x1xf32>
    %22 = arith.addf %20, %21 : vector<8x1xf32>
    %23 = math.rsqrt %22 : vector<8x1xf32>
    %24 = vector.broadcast %23 : vector<8x1xf32> to vector<8x128xf32>
    %25 = arith.mulf %11, %24 : vector<8x128xf32>
    %c0_11 = arith.constant 0 : index
    %c0_12 = arith.constant 0 : index
    %26 = vector.load %arg4[%c0_11, %c0_12] : memref<1x128xf32, #tpu.memory_space<vmem>>, vector<1x128xf32>
    %27 = vector.broadcast %26 : vector<1x128xf32> to vector<8x128xf32>
    %28 = arith.mulf %25, %27 : vector<8x128xf32>
    %c0_13 = arith.constant 0 : index
    %c0_14 = arith.constant 0 : index
    %29 = vector.load %arg5[%c0_13, %c0_14] : memref<1x128xf32, #tpu.memory_space<vmem>>, vector<1x128xf32>
    %30 = vector.broadcast %29 : vector<1x128xf32> to vector<8x128xf32>
    %31 = arith.addf %28, %30 : vector<8x128xf32>
    %cst_15 = arith.constant 0.000000e+00 : f32
    %32 = vector.broadcast %cst_15 : f32 to vector<8x128xf32>
    %33 = arith.maximumf %31, %32 : vector<8x128xf32>
    %c0_16 = arith.constant 0 : index
    %c0_17 = arith.constant 0 : index
    %34 = vector.load %arg6[%c0_16, %c0_17] : memref<8x128xf32, #tpu.memory_space<vmem>>, vector<8x128xf32>
    tpu.vector_store %arg6[%c0_16, %c0_17], %33 {strides = array<i32>} : memref<8x128xf32, #tpu.memory_space<vmem>>, vector<8x128xf32>,
    return
  }
  func.func @transform_0(%arg0: i32) -> (i32, i32) {
    %c0_i32 = arith.constant 0 : i32
    %c0_i32_0 = arith.constant 0 : i32
    return %arg0, %c0_i32 : i32, i32
  }
  func.func @transform_1(%arg0: i32) -> (i32, i32) {
    %c0_i32 = arith.constant 0 : i32
    %c0_i32_0 = arith.constant 0 : i32
    %c0_i32_1 = arith.constant 0 : i32
    return %c0_i32, %c0_i32_0 : i32, i32
  }
  func.func @transform_2(%arg0: i32) -> (i32, i32) {
    %c0_i32 = arith.constant 0 : i32
    %c0_i32_0 = arith.constant 0 : i32
    %c0_i32_1 = arith.constant 0 : i32
    return %c0_i32, %c0_i32_0 : i32, i32
  }
  func.func @transform_3(%arg0: i32) -> (i32, i32) {
    %c0_i32 = arith.constant 0 : i32
    %c0_i32_0 = arith.constant 0 : i32
    %c0_i32_1 = arith.constant 0 : i32
    return %c0_i32, %c0_i32_0 : i32, i32
  }
  func.func @transform_4(%arg0: i32) -> (i32, i32) {
    %c0_i32 = arith.constant 0 : i32
    %c0_i32_0 = arith.constant 0 : i32
    %c0_i32_1 = arith.constant 0 : i32
    return %c0_i32, %c0_i32_0 : i32, i32
  }
  func.func @transform_5(%arg0: i32) -> (i32, i32) {
    %c0_i32 = arith.constant 0 : i32
    %c0_i32_0 = arith.constant 0 : i32
    return %arg0, %c0_i32 : i32, i32
  }
}

</mosaic_0001>

<bundles_post_ra>
// kernel: node_encoder.1
= control target key start
LH: loop header
LB: loop body
LE: loop exit
PB: predicated region body
PF: predicated region fallthrough
CT: control target
= control target key end

     0   :  { %s469_s18 = smov 0   ;;  %s504_s0 = inlined_call_operand.vmem [shape: f32[16,16], index: 0, kind: input, shape index: {}]   ;;  %s505_s1 = inlined_call_operand.vmem [shape: f32[16,128], index: 1, kind: input, shape index: {}]   ;;  %s506_s2 = inlined_call_operand.vmem [shape: f32[1,128], index: 2, kind: input, shape index: {}]   ;;  %s507_s3 = inlined_call_operand.vmem [shape: f32[1,128], index: 3, kind: input, shape index: {}]   ;;  %s508_s4 = inlined_call_operand.vmem [shape: f32[1,128], index: 4, kind: input, shape index: {}]   ;;  %s509_s5 = inlined_call_operand.vmem [shape: f32[16,128], index: 5, kind: output, shape index: {}]  }
   0x1 LB: > { %s389_s19 = sadd.s32 4294967295, %s434_s18   ;;  %p393_p0 = scmp.ge.s32.totalorder %s434_s18, 1  ;;  %s434_s18 = sphi %s469_s18, %s15_s18  }
   0x2   : > { %p186_p1 = scmp.lt.s32.totalorder %s434_s18, 3 }
   0x4   : > { %p187_p2 = pnand %p393_p0, %p186_p1 }
   0x5   : > { %v221_v0 = vld [vmem:[%s505_s1] sm:$0xff] (!%p187_p2)  ;;  %v222_v1 = vld [vmem:[%s505_s1 + $0x8] sm:$0xff] (!%p187_p2)  ;;  %p212_p3 = scmp.lt.s32.totalorder (!%p187_p2), %s389_s19, 1  ;;  %v436_v2 = vmov (!%p187_p2), 0.0|0.0   ;;  %vm437_vm0 = vmmov (!%p187_p2), 0   ;;  %v438_v4 = vmov (!%p187_p2), 0.0  }
   0x6   : > { %190 = sbr.rel (%p187_p2) target bundleno = 547 (0x223), region = 40  ;;  %412 = vmatprep.subr.bf16.mxu0 (!%p187_p2), %v436_v2  ;;  %v413_v3 = vpack.c.bf16 (!%p187_p2), %v222_v1, %v221_v0  ;;  %409 = vmatprep.mubr.msk.f32.mxu0 (!%p187_p2), %vm437_vm0, %v438_v4  ;;  %vm230_vm1 = vcmask (!%p187_p2), 130048   ;;  %v396_v6 = vld [vmem:[%s506_s2] ss:$0 sm:$0xff] (!%p187_p2) }
   0x7   : > { %v398_v21 = vld [vmem:[%s507_s3] ss:$0 sm:$0xff] (!%p187_p2) }
   0x8   : > { %414 = vmatpush3.bf16.msra.mxu0 (!%p187_p2), %v413_v3  ;;  %v399_v23 = vld [vmem:[%s508_s4] ss:$0 sm:$0xff] (!%p187_p2) }
   0xd   : > { %s511_s19 = smov (!%p212_p3, %s389_s19), 1 }
   0xe   : > { %s394_s24 = sshll.u32 %s511_s19, 3 }
   0xf   : > { %s215_s27 = scalar_lea.vmem %s504_s0, %s394_s24  ;;  %s219_s11 = scalar_lea.vmem %s509_s5, %s394_s24 }
  0x10   : > { %v220_v5 = vld [vmem:[%s215_s27] sm:$0xff] }
  0x11   : > { %410 = vmatmul.mubr.msk.f32.vlgmr.msra.gmra.mrb[0].mxu0 %vm230_vm1, %v220_v5 }
  0xe4   : > { %v300_v7 = vpop.f32.mrb[0].mxu0 }
  0xe5   : > { %v301_v8 = vadd.f32 %v396_v6, %v300_v7  ;;  %v411_v9 = vpop.f32.mrb[1].mxu0 }
  0xe7   : > { %304 = vadd.xlane.f32.xlu0 %v301_v8 }
 0x174   : > { %v305_v10 = vpop.xlane.xlu0 %304 }
 0x175   : > { %v306_v11 = vmul.f32 0.03125, %v305_v10 }
 0x177   : > { %v307_v12 = vsub.f32 %v301_v8, %v306_v11  ;;  %v311_v14 = vmul.f32 96.0, %v306_v11 }
 0x179   : > { %v308_v13 = vmul.f32 %v307_v12, %v307_v12  ;;  %v312_v15 = vmul.f32 %v311_v14, %v306_v11 }
 0x17b   : > { %309 = vadd.xlane.f32.xlu0 %v308_v13 }
 0x208   : > { %v310_v16 = vpop.xlane.xlu0 %309 }
 0x209   : > { %v313_v17 = vsub.f32 %v310_v16, %v312_v15 }
 0x20b   : > { %v314_v18 = vmul.f32 0.03125, %v313_v17 }
 0x20d   : > { %v315_v19 = vadd.f32 1e-05, %v314_v18 }
 0x20f   : > { %426 = vrsqrt.f32 %v315_v19 }
 0x219   : > { %v427_v20 = vpop.eup %426 }
 0x21a   : > { %v317_v22 = vmul.f32 %v427_v20, %v307_v12 }
 0x21c   : > { %v325_v24 = vmul.f32 %v398_v21, %v317_v22 }
 0x21e   : > { %v333_v25 = vadd.f32 %v399_v23, %v325_v24 }
 0x220   : > { %v334_v26 = vmax.f32 %v333_v25, 0.0 }
 0x222   : > { %335 = vst [vmem:[%s219_s11] sm:$0xff] %v334_v26 }
 0x223 PF: > { %s15_s18 = sadd.s32 1, %s434_s18  }
 0x224   : > { %p12_p4 = scmp.ge.s32.totalorder %s15_s18, 4  }
 0x226   :  { %14 = sbr.rel (!%p12_p4) target bundleno = 1 (0x1), region = 70 }

</bundles_post_ra>
